<compile_context>
chip_gen: v7x
topology: tpu7x:2x2x1
jax: 0.10.0
libtpu: 0.0.40
codegen_flags: <defaults>
</compile_context>

<pallas_src>
import functools

import jax
import jax.numpy as jnp
from jax.experimental import pallas as pl
from jax.experimental.pallas import tpu as pltpu


# Row-tile default: multiple of 8 (sublane), 128 (v5e MXU rows) and 256
# (v6e/v7x MXU rows).
DEFAULT_TILE_ROWS = 512
_VMEM_LIMIT_BYTES = 64 * 1024 * 1024   # scoped-VMEM ceiling requested from Mosaic
_VMEM_BUDGET_BYTES = 40 * 1024 * 1024  # what our own buffers are allowed to use


def _round_up(x, m):
    return (x + m - 1) // m * m


def _choose_tile_rows(n_rows, requested, stream_bytes_per_row, const_bytes):
    """Largest row tile (multiple of 8) such that double-buffered streamed tiles
    plus the single-buffered constant operands fit the VMEM budget."""
    tm = max(8, (int(requested) // 8) * 8)
    while tm > 8 and const_bytes + 2 * stream_bytes_per_row * tm > _VMEM_BUDGET_BYTES:
        tm = max(8, ((tm // 2) // 8) * 8)
    if n_rows <= tm:
        return _round_up(n_rows, 8)
    return tm


def _const_spec(shape):
    # Grid-constant operand (index_map always returns the same block):
    # single-buffer it so the resident projection weight / LN params are not
    # double-buffered.
    return pl.BlockSpec(shape, lambda i: (0,) * len(shape),
                        pipeline_mode=pl.Buffered(1))


def _adaln_kernel(x_ref, e_ref, ws_ref, wsh_ref, bs_ref, bsh_ref,
                  g_ref, b_ref, o_ref, *, eps):
    # x/e: (TM, D); ws/wsh: (D, D) pre-transposed projection halves;
    # bs/bsh/g/b: (1, D); o: (TM, D).
    #
    # Projection: two (TM,D)x(D,D) MXU matmuls with f32 accumulation; operands
    # stay in native dtype (bf16 inputs hit the native MXU path).
    e = e_ref[...]
    scale = jnp.dot(e, ws_ref[...], preferred_element_type=jnp.float32)
    scale = scale + bs_ref[...].astype(jnp.float32)
    shift = jnp.dot(e, wsh_ref[...], preferred_element_type=jnp.float32)
    shift = shift + bsh_ref[...].astype(jnp.float32)

    # LayerNorm statistics in f32 (biased variance, like torch.nn.LayerNorm).
    x = x_ref[...].astype(jnp.float32)
    mean = jnp.mean(x, axis=-1, keepdims=True)
    centered = x - mean
    var = jnp.mean(centered * centered, axis=-1, keepdims=True)
    normed = centered * jax.lax.rsqrt(var + eps)
    normed = normed * g_ref[...].astype(jnp.float32) + b_ref[...].astype(jnp.float32)

    o_ref[...] = (scale * normed + shift).astype(o_ref.dtype)


def _ln_only_kernel(x_ref, g_ref, b_ref, o_ref, *, eps):
    x = x_ref[...].astype(jnp.float32)
    mean = jnp.mean(x, axis=-1, keepdims=True)
    centered = x - mean
    var = jnp.mean(centered * centered, axis=-1, keepdims=True)
    normed = centered * jax.lax.rsqrt(var + eps)
    normed = normed * g_ref[...].astype(jnp.float32) + b_ref[...].astype(jnp.float32)
    o_ref[...] = normed.astype(o_ref.dtype)


def prepare_adaln_params(params):
    """One-time parameter prep (call at load time, NOT per forward step).

    Splits the torch-layout nn.Linear(D, 2D) weight (2D, D) into two (D, D)
    halves and pre-transposes them so the kernel computes `e @ W_half` with no
    per-call HBM transpose, no (TM, 2D) intermediate and no column slicing.
    """
    D = params["ln_weight"].shape[-1]
    w = jnp.asarray(params["proj_weight"])     # (2D, D)
    b = jnp.asarray(params["proj_bias"])       # (2D,)
    return {
        "w_scale": w[:D].T,                    # (D, D): scale = e @ w_scale
        "w_shift": w[D:].T,                    # (D, D): shift = e @ w_shift
        "b_scale": b[:D].reshape(1, D),
        "b_shift": b[D:].reshape(1, D),
        "ln_weight": jnp.asarray(params["ln_weight"]).reshape(1, D),
        "ln_bias": jnp.asarray(params["ln_bias"]).reshape(1, D),
    }


def adaptive_layer_norm(x, embedding, params, *, eps=1e-5,
                        tile_rows=DEFAULT_TILE_ROWS):
    """x, embedding: (..., D) (embedding may be None).

    `params` must come from prepare_adaln_params (pre-split projection weight).
    """
    orig_shape = x.shape
    D = orig_shape[-1]
    N = 1
    for s in orig_shape[:-1]:
        N *= s
    x2 = x.reshape(N, D)

    gamma, beta = params["ln_weight"], params["ln_bias"]
    x_isz = jnp.dtype(x.dtype).itemsize

    if embedding is None:
        stream_bpr = D * 2 * x_isz                          # x in + out
        const_bytes = 2 * D * jnp.dtype(gamma.dtype).itemsize
    else:
        e_isz = jnp.dtype(embedding.dtype).itemsize
        w_isz = jnp.dtype(params["w_scale"].dtype).itemsize
        stream_bpr = D * (2 * x_isz + e_isz)                # x + e in, out
        # TODO(synk): for very large D (weights alone > VMEM budget) the
        # projection would need K/N tiling of the weight; out of scope here.
        const_bytes = 2 * D * D * w_isz + 6 * D * 4

    tm = _choose_tile_rows(N, tile_rows, stream_bpr, const_bytes)
    grid = (pl.cdiv(N, tm),)   # edge block masked by Pallas; no jnp.pad copy

    # TODO(synk): for D < 128 (toy shapes only) the output stores are
    # lane-masked; production D (>=512) is lane-dense so no packing is done.
    row_spec = pl.BlockSpec((tm, D), lambda i: (i, 0))
    cparams = pltpu.CompilerParams(
        dimension_semantics=("parallel",),          # row tiles independent -> megacore
        vmem_limit_bytes=_VMEM_LIMIT_BYTES,
    )

    if embedding is None:
        out = pl.pallas_call(
            functools.partial(_ln_only_kernel, eps=eps),
            out_shape=jax.ShapeDtypeStruct((N, D), x.dtype),
            grid_spec=pltpu.PrefetchScalarGridSpec(
                num_scalar_prefetch=0,
                grid=grid,
                in_specs=[
                    row_spec,                 # x rows
                    _const_spec((1, D)),      # ln gamma
                    _const_spec((1, D)),      # ln beta
                ],
                out_specs=row_spec,
            ),
            compiler_params=cparams,
        )(x2, gamma, beta)
    else:
        e2 = embedding.reshape(N, D)
        out = pl.pallas_call(
            functools.partial(_adaln_kernel, eps=eps),
            out_shape=jax.ShapeDtypeStruct((N, D), x.dtype),
            grid_spec=pltpu.PrefetchScalarGridSpec(
                num_scalar_prefetch=0,
                grid=grid,
                in_specs=[
                    row_spec,                 # x rows
                    row_spec,                 # embedding rows
                    _const_spec((D, D)),      # W_scale (pre-transposed, native dtype)
                    _const_spec((D, D)),      # W_shift
                    _const_spec((1, D)),      # b_scale
                    _const_spec((1, D)),      # b_shift
                    _const_spec((1, D)),      # ln gamma
                    _const_spec((1, D)),      # ln beta
                ],
                out_specs=row_spec,
            ),
            compiler_params=cparams,
        )(x2, e2, params["w_scale"], params["w_shift"],
          params["b_scale"], params["b_shift"], gamma, beta)

    return out.reshape(orig_shape)


def reference_adaln(x, embedding, raw_params, eps=1e-5):
    """Pure-JAX reference mirroring the PyTorch forward (torch param layout)."""
    gamma = raw_params["ln_weight"]
    beta = raw_params["ln_bias"]
    mean = jnp.mean(x, axis=-1, keepdims=True)
    var = jnp.mean((x - mean) ** 2, axis=-1, keepdims=True)
    normed = (x - mean) / jnp.sqrt(var + eps) * gamma + beta
    if embedding is None:
        return normed
    proj = embedding @ raw_params["proj_weight"].T + raw_params["proj_bias"]
    D = x.shape[-1]
    weight, bias = proj[..., :D], proj[..., D:]
    return weight * normed + bias


if __name__ == "__main__":
    B, T, D = 2, 8, 32
    key = jax.random.PRNGKey(0)
    k1, k2, k3, k4 = jax.random.split(key, 4)

    x = jax.random.normal(k1, (B, T, D), dtype=jnp.float32)
    emb = jax.random.normal(k2, (B, T, D), dtype=jnp.float32)

    # nn.Linear(d_model, 2*d_model) + nn.LayerNorm(d_model) parameter shapes.
    raw_params = {
        "proj_weight": 0.05 * jax.random.normal(k3, (2 * D, D), dtype=jnp.float32),
        "proj_bias": 0.01 * jax.random.normal(k4, (2 * D,), dtype=jnp.float32),
        "ln_weight": jnp.ones((D,), dtype=jnp.float32),
        "ln_bias": jnp.zeros((D,), dtype=jnp.float32),
    }
    params = prepare_adaln_params(raw_params)   # one-time prep (split/transpose)

    out = jax.block_until_ready(adaptive_layer_norm(x, emb, params, eps=1e-5))
    ref = reference_adaln(x, emb, raw_params, eps=1e-5)
    assert out.shape == (B, T, D)
    assert jnp.allclose(out, ref, atol=1e-5, rtol=1e-5), "mismatch vs reference"

    # embedding=None path (plain LayerNorm)
    out_ln = jax.block_until_ready(adaptive_layer_norm(x, None, params, eps=1e-5))
    ref_ln = reference_adaln(x, None, raw_params, eps=1e-5)
    assert jnp.allclose(out_ln, ref_ln, atol=1e-5, rtol=1e-5), "LN mismatch"

    print("KERNEL_OK")
</pallas_src>

<mosaic_0001>
module attributes {stable_mosaic.version = 11 : i64} {
  func.func @_adaln_kernel(%arg0: i32, %arg1: memref<16x32xf32, #tpu.memory_space<vmem>>, %arg2: memref<16x32xf32, #tpu.memory_space<vmem>>, %arg3: memref<32x32xf32, #tpu.memory_space<vmem>>, %arg4: memref<32x32xf32, #tpu.memory_space<vmem>>, %arg5: memref<1x32xf32, #tpu.memory_space<vmem>>, %arg6: memref<1x32xf32, #tpu.memory_space<vmem>>, %arg7: memref<1x32xf32, #tpu.memory_space<vmem>>, %arg8: memref<1x32xf32, #tpu.memory_space<vmem>>, %arg9: memref<16x32xf32, #tpu.memory_space<vmem>>) attributes {dimension_semantics = [#tpu.dimension_semantics<parallel>], iteration_bounds = array<i64: 1>, scalar_prefetch = 0 : i64, scratch_operands = 0 : i64, tpu.core_type = #tpu.core_type<tc>, window_params = [{transform_indices = @transform_0, window_bounds = array<i64: 16, 32>}, {transform_indices = @transform_1, window_bounds = array<i64: 16, 32>}, {pipeline_mode = #tpu.pipeline_mode<synchronous>, transform_indices = @transform_2, window_bounds = array<i64: 32, 32>}, {pipeline_mode = #tpu.pipeline_mode<synchronous>, transform_indices = @transform_3, window_bounds = array<i64: 32, 32>}, {pipeline_mode = #tpu.pipeline_mode<synchronous>, transform_indices = @transform_4, window_bounds = array<i64: 1, 32>}, {pipeline_mode = #tpu.pipeline_mode<synchronous>, transform_indices = @transform_5, window_bounds = array<i64: 1, 32>}, {pipeline_mode = #tpu.pipeline_mode<synchronous>, transform_indices = @transform_6, window_bounds = array<i64: 1, 32>}, {pipeline_mode = #tpu.pipeline_mode<synchronous>, transform_indices = @transform_7, window_bounds = array<i64: 1, 32>}, {transform_indices = @transform_8, window_bounds = array<i64: 16, 32>}]} {
    %c0 = arith.constant 0 : index
    %c0_0 = arith.constant 0 : index
    %0 = vector.load %arg2[%c0, %c0_0] : memref<16x32xf32, #tpu.memory_space<vmem>>, vector<16x32xf32>
    %c0_1 = arith.constant 0 : index
    %c0_2 = arith.constant 0 : index
    %1 = vector.load %arg3[%c0_1, %c0_2] : memref<32x32xf32, #tpu.memory_space<vmem>>, vector<32x32xf32>
    %cst = arith.constant dense<0.000000e+00> : vector<16x32xf32>
    %2 = tpu.matmul %0, %1, %cst {dimension_numbers = #tpu.dot_dimension_numbers<[1], [0], [0], [1], [0, 0, 1, 1], [], []>} : vector<16x32xf32>, vector<32x32xf32>, vector<16x32xf32> -> vector<16x32xf32>
    %c0_3 = arith.constant 0 : index
    %c0_4 = arith.constant 0 : index
    %3 = vector.load %arg5[%c0_3, %c0_4] : memref<1x32xf32, #tpu.memory_space<vmem>>, vector<1x32xf32>
    %4 = vector.broadcast %3 : vector<1x32xf32> to vector<16x32xf32>
    %5 = arith.addf %2, %4 : vector<16x32xf32>
    %c0_5 = arith.constant 0 : index
    %c0_6 = arith.constant 0 : index
    %6 = vector.load %arg4[%c0_5, %c0_6] : memref<32x32xf32, #tpu.memory_space<vmem>>, vector<32x32xf32>
    %cst_7 = arith.constant dense<0.000000e+00> : vector<16x32xf32>
    %7 = tpu.matmul %0, %6, %cst_7 {dimension_numbers = #tpu.dot_dimension_numbers<[1], [0], [0], [1], [0, 0, 1, 1], [], []>} : vector<16x32xf32>, vector<32x32xf32>, vector<16x32xf32> -> vector<16x32xf32>
    %c0_8 = arith.constant 0 : index
    %c0_9 = arith.constant 0 : index
    %8 = vector.load %arg6[%c0_8, %c0_9] : memref<1x32xf32, #tpu.memory_space<vmem>>, vector<1x32xf32>
    %9 = vector.broadcast %8 : vector<1x32xf32> to vector<16x32xf32>
    %10 = arith.addf %7, %9 : vector<16x32xf32>
    %c0_10 = arith.constant 0 : index
    %c0_11 = arith.constant 0 : index
    %11 = vector.load %arg1[%c0_10, %c0_11] : memref<16x32xf32, #tpu.memory_space<vmem>>, vector<16x32xf32>
    %cst_12 = arith.constant dense<0.000000e+00> : vector<16xf32>
    %12 = vector.multi_reduction <add>, %11, %cst_12 [1] : vector<16x32xf32> to vector<16xf32>
    %13 = vector.shape_cast %12 : vector<16xf32> to vector<16x1xf32>
    %cst_13 = arith.constant 3.200000e+01 : f32
    %14 = vector.broadcast %cst_13 : f32 to vector<16x1xf32>
    %15 = arith.divf %13, %14 : vector<16x1xf32>
    %16 = vector.broadcast %15 : vector<16x1xf32> to vector<16x32xf32>
    %17 = arith.subf %11, %16 : vector<16x32xf32>
    %18 = arith.mulf %17, %17 : vector<16x32xf32>
    %cst_14 = arith.constant dense<0.000000e+00> : vector<16xf32>
    %19 = vector.multi_reduction <add>, %18, %cst_14 [1] : vector<16x32xf32> to vector<16xf32>
    %20 = vector.shape_cast %19 : vector<16xf32> to vector<16x1xf32>
    %cst_15 = arith.constant 3.200000e+01 : f32
    %21 = vector.broadcast %cst_15 : f32 to vector<16x1xf32>
    %22 = arith.divf %20, %21 : vector<16x1xf32>
    %cst_16 = arith.constant 9.99999974E-6 : f32
    %23 = vector.broadcast %cst_16 : f32 to vector<16x1xf32>
    %24 = arith.addf %22, %23 : vector<16x1xf32>
    %25 = math.rsqrt %24 : vector<16x1xf32>
    %26 = vector.broadcast %25 : vector<16x1xf32> to vector<16x32xf32>
    %27 = arith.mulf %17, %26 : vector<16x32xf32>
    %c0_17 = arith.constant 0 : index
    %c0_18 = arith.constant 0 : index
    %28 = vector.load %arg7[%c0_17, %c0_18] : memref<1x32xf32, #tpu.memory_space<vmem>>, vector<1x32xf32>
    %29 = vector.broadcast %28 : vector<1x32xf32> to vector<16x32xf32>
    %30 = arith.mulf %27, %29 : vector<16x32xf32>
    %c0_19 = arith.constant 0 : index
    %c0_20 = arith.constant 0 : index
    %31 = vector.load %arg8[%c0_19, %c0_20] : memref<1x32xf32, #tpu.memory_space<vmem>>, vector<1x32xf32>
    %32 = vector.broadcast %31 : vector<1x32xf32> to vector<16x32xf32>
    %33 = arith.addf %30, %32 : vector<16x32xf32>
    %34 = arith.mulf %5, %33 : vector<16x32xf32>
    %35 = arith.addf %34, %10 : vector<16x32xf32>
    %c0_21 = arith.constant 0 : index
    %c0_22 = arith.constant 0 : index
    %36 = vector.load %arg9[%c0_21, %c0_22] : memref<16x32xf32, #tpu.memory_space<vmem>>, vector<16x32xf32>
    tpu.vector_store %arg9[%c0_21, %c0_22], %35 {strides = array<i32>} : memref<16x32xf32, #tpu.memory_space<vmem>>, vector<16x32xf32>,
    return
  }
  func.func @transform_0(%arg0: i32) -> (i32, i32) {
    %c0_i32 = arith.constant 0 : i32
    %c0_i32_0 = arith.constant 0 : i32
    return %arg0, %c0_i32 : i32, i32
  }
  func.func @transform_1(%arg0: i32) -> (i32, i32) {
    %c0_i32 = arith.constant 0 : i32
    %c0_i32_0 = arith.constant 0 : i32
    return %arg0, %c0_i32 : i32, i32
  }
  func.func @transform_2(%arg0: i32) -> (i32, i32) {
    %c0_i32 = arith.constant 0 : i32
    %c0_i32_0 = arith.constant 0 : i32
    %c0_i32_1 = arith.constant 0 : i32
    return %c0_i32, %c0_i32_0 : i32, i32
  }
  func.func @transform_3(%arg0: i32) -> (i32, i32) {
    %c0_i32 = arith.constant 0 : i32
    %c0_i32_0 = arith.constant 0 : i32
    %c0_i32_1 = arith.constant 0 : i32
    return %c0_i32, %c0_i32_0 : i32, i32
  }
  func.func @transform_4(%arg0: i32) -> (i32, i32) {
    %c0_i32 = arith.constant 0 : i32
    %c0_i32_0 = arith.constant 0 : i32
    %c0_i32_1 = arith.constant 0 : i32
    return %c0_i32, %c0_i32_0 : i32, i32
  }
  func.func @transform_5(%arg0: i32) -> (i32, i32) {
    %c0_i32 = arith.constant 0 : i32
    %c0_i32_0 = arith.constant 0 : i32
    %c0_i32_1 = arith.constant 0 : i32
    return %c0_i32, %c0_i32_0 : i32, i32
  }
  func.func @transform_6(%arg0: i32) -> (i32, i32) {
    %c0_i32 = arith.constant 0 : i32
    %c0_i32_0 = arith.constant 0 : i32
    %c0_i32_1 = arith.constant 0 : i32
    return %c0_i32, %c0_i32_0 : i32, i32
  }
  func.func @transform_7(%arg0: i32) -> (i32, i32) {
    %c0_i32 = arith.constant 0 : i32
    %c0_i32_0 = arith.constant 0 : i32
    %c0_i32_1 = arith.constant 0 : i32
    return %c0_i32, %c0_i32_0 : i32, i32
  }
  func.func @transform_8(%arg0: i32) -> (i32, i32) {
    %c0_i32 = arith.constant 0 : i32
    %c0_i32_0 = arith.constant 0 : i32
    return %arg0, %c0_i32 : i32, i32
  }
}

</mosaic_0001>

<bundles_post_ra>
// kernel: tpu_custom_call.1
= control target key start
LH: loop header
LB: loop body
LE: loop exit
PB: predicated region body
PF: predicated region fallthrough
CT: control target
= control target key end

     0   :  { %13 = vsyncpa [#allocation3], 0  ;;  %s872_s0 = inlined_call_operand.hbm [shape: f32[16,32], index: 0, kind: input, shape index: {}]   ;;  %s873_s1 = inlined_call_operand.hbm [shape: f32[16,32], index: 1, kind: input, shape index: {}]   ;;  %s874_s2 = inlined_call_operand.hbm [shape: f32[32,32], index: 2, kind: input, shape index: {}]   ;;  %s875_s3 = inlined_call_operand.hbm [shape: f32[32,32], index: 3, kind: input, shape index: {}]   ;;  %s876_s4 = inlined_call_operand.hbm [shape: f32[1,32], index: 4, kind: input, shape index: {}]   ;;  %s877_s5 = inlined_call_operand.hbm [shape: f32[1,32], index: 5, kind: input, shape index: {}]   ;;  %s878_s6 = inlined_call_operand.hbm [shape: f32[1,32], index: 6, kind: input, shape index: {}]   ;;  %s879_s7 = inlined_call_operand.hbm [shape: f32[1,32], index: 7, kind: input, shape index: {}]   ;;  %s880_s8 = inlined_call_operand.hbm [shape: f32[16,32], index: 8, kind: output, shape index: {}]  }
   0x1   :  { %14 = vsyncpa [#allocation6], 0 }
   0x2   :  { %15 = vsyncpa [#allocation9], 0 }
   0x3   :  { %16 = vsyncpa [#allocation12], 0 }
   0x4   :  { %17 = vsyncpa [#allocation15], 0 }
   0x5   :  { %18 = vsyncpa [#allocation4], 0  ;;  %s669_s27 = smov [#allocation5]   ;;  %s670_s29 = smov [#allocation8]  }
   0x6   :  { %s36_s28 = sshll.u32 %s669_s27, 4  ;;  %s60_s30 = sshll.u32 %s670_s29, 4  ;;  %s37_s28 = int_to_ptr.vmem [resolvable:$true] %s36_s28  ;;  %s725_s30 = int_to_ptr.vmem [resolvable:$true] %s60_s30 }
   0x7   :  { %s459_s11 = scalar_lea.hbm %s873_s1, 256 }
   0x8   :  { %p460_p0 = scmp.ne.s32.totalorder %s873_s1, %s459_s11  ;;  %p463_p1 = scmp.lt.u32.totalorder %s459_s11, %s873_s1 }
   0xa   :  { %p465_p2 = pnand %p463_p1, %p460_p0 }
   0xc   :  { %468 = shalt.err (!%p465_p2)
}
   0xd   :  { %s469_s16 = scalar_lea.vmem %s37_s28, 256  ;;  %p474_p4 = scmp.lt.s32.totalorder %s37_s28, %s37_s28 }
   0xe   :  { %p470_p3 = scmp.ne.s32.totalorder %s37_s28, %s469_s16  ;;  %p475_p5 = scmp.lt.s32.totalorder %s469_s16, %s469_s16 }
  0x10   :  { %p476_p6 = por %p475_p5, %p474_p4 }
  0x12   :  { %p477_p7 = pnand %p476_p6, %p470_p3 }
  0x14   :  { %480 = shalt.err (!%p477_p7)
}
  0x15   :  { %s671_s17 = smov 128   ;;  %s672_s18 = smov 8  }
  0x16   :  { %42 = dma.hbm_to_vmem [thread:$0]  %s873_s1, 256, %s37_s28, [#allocation6], %s671_s17, %s671_s17, %s672_s18  }
  0x17   :  { %s481_s23 = scalar_lea.hbm %s875_s3, 512 }
  0x18   :  { %p482_p8 = scmp.ne.s32.totalorder %s875_s3, %s481_s23  ;;  %p485_p9 = scmp.lt.u32.totalorder %s481_s23, %s875_s3 }
  0x1a   :  { %p487_p10 = pnand %p485_p9, %p482_p8 }
  0x1c   :  { %490 = shalt.err (!%p487_p10)
}
  0x1d   :  { %s491_s29 = scalar_lea.vmem %s725_s30, 512  ;;  %p496_p12 = scmp.lt.s32.totalorder %s725_s30, %s725_s30 }
  0x1e   :  { %p492_p11 = scmp.ne.s32.totalorder %s725_s30, %s491_s29  ;;  %p497_p13 = scmp.lt.s32.totalorder %s491_s29, %s491_s29 }
  0x20   :  { %p498_p0 = por %p497_p13, %p496_p12 }
  0x22   :  { %p499_p1 = pnand %p498_p0, %p492_p11 }
  0x24   :  { %502 = shalt.err (!%p499_p1)
}
  0x25   :  { %66 = dma.hbm_to_vmem [thread:$0]  %s875_s3, 512, %s725_s30, [#allocation9], %s671_s17, %s671_s17, %s672_s18  }
  0x26   :  { %s673_s9 = smov [#allocation11]   ;;  %s674_s11 = smov [#allocation2]  }
  0x27   :  { %s83_s10 = sshll.u32 %s673_s9, 4  ;;  %s24_s12 = sshll.u32 %s674_s11, 4  ;;  %s84_s10 = int_to_ptr.vmem [resolvable:$true] %s83_s10  ;;  %s762_s12 = int_to_ptr.vmem [resolvable:$true] %s24_s12 }
  0x28   :  { %s503_s15 = scalar_lea.hbm %s877_s5, 16 }
  0x29   :  { %p504_p2 = scmp.ne.s32.totalorder %s877_s5, %s503_s15  ;;  %p507_p3 = scmp.lt.u32.totalorder %s503_s15, %s877_s5 }
  0x2b   :  { %p509_p4 = pnand %p507_p3, %p504_p2 }
  0x2d   :  { %512 = shalt.err (!%p509_p4)
}
  0x2e   :  { %s513_s3 = scalar_lea.vmem %s84_s10, 16  ;;  %s517_s30 = scalar_lea.vmem %s84_s10, 32 }
  0x2f   :  { %p514_p5 = scmp.ne.s32.totalorder %s84_s10, %s513_s3  ;;  %p518_p6 = scmp.lt.s32.totalorder %s84_s10, %s84_s10 }
  0x30   :  { %p519_p7 = scmp.lt.s32.totalorder %s517_s30, %s513_s3 }
  0x32   :  { %p520_p8 = por %p519_p7, %p518_p6 }
  0x34   :  { %p521_p9 = pnand %p520_p8, %p514_p5 }
  0x36   :  { %524 = shalt.err (!%p521_p9)
}
  0x37   :  { %86 = dma.hbm_to_vmem [thread:$0]  %s877_s5, 16, %s84_s10, [#allocation12]  }
  0x38   :  { %s525_s26 = scalar_lea.hbm %s872_s0, 256 }
  0x39   :  { %p526_p10 = scmp.ne.s32.totalorder %s872_s0, %s525_s26  ;;  %p529_p11 = scmp.lt.u32.totalorder %s525_s26, %s872_s0 }
  0x3b   :  { %p531_p12 = pnand %p529_p11, %p526_p10 }
  0x3d   :  { %534 = shalt.err (!%p531_p12)
}
  0x3e   :  { %s535_s9 = scalar_lea.vmem %s762_s12, 256  ;;  %p540_p0 = scmp.lt.s32.totalorder %s762_s12, %s762_s12 }
  0x3f   :  { %p536_p13 = scmp.ne.s32.totalorder %s762_s12, %s535_s9  ;;  %p541_p1 = scmp.lt.s32.totalorder %s535_s9, %s535_s9 }
  0x41   :  { %p542_p2 = por %p541_p1, %p540_p0 }
  0x43   :  { %p543_p3 = pnand %p542_p2, %p536_p13 }
  0x45   :  { %546 = shalt.err (!%p543_p3)
}
  0x46   :  { %30 = dma.hbm_to_vmem [thread:$0]  %s872_s0, 256, %s762_s12, [#allocation3], %s671_s17, %s671_s17, %s672_s18  }
  0x47   :  { %s675_s11 = smov [#allocation7]   ;;  %s676_s14 = smov [#allocation10]  }
  0x48   :  { %s48_s13 = sshll.u32 %s675_s11, 4  ;;  %s73_s15 = sshll.u32 %s676_s14, 4  ;;  %s49_s13 = int_to_ptr.vmem [resolvable:$true] %s48_s13  ;;  %s74_s15 = int_to_ptr.vmem [resolvable:$true] %s73_s15 }
  0x49   :  { %s547_s20 = scalar_lea.hbm %s874_s2, 512 }
  0x4a   :  { %p548_p4 = scmp.ne.s32.totalorder %s874_s2, %s547_s20  ;;  %p551_p5 = scmp.lt.u32.totalorder %s547_s20, %s874_s2 }
  0x4c   :  { %p553_p6 = pnand %p551_p5, %p548_p4 }
  0x4e   :  { %556 = shalt.err (!%p553_p6)
}
  0x4f   :  { %s557_s0 = scalar_lea.vmem %s49_s13, 512  ;;  %p562_p8 = scmp.lt.s32.totalorder %s49_s13, %s49_s13 }
  0x50   :  { %p558_p7 = scmp.ne.s32.totalorder %s49_s13, %s557_s0  ;;  %p563_p9 = scmp.lt.s32.totalorder %s557_s0, %s557_s0 }
  0x52   :  { %p564_p10 = por %p563_p9, %p562_p8 }
  0x54   :  { %p565_p11 = pnand %p564_p10, %p558_p7 }
  0x56   :  { %568 = shalt.err (!%p565_p11)
}
  0x57   :  { %54 = dma.hbm_to_vmem [thread:$0]  %s874_s2, 512, %s49_s13, [#allocation6], %s671_s17, %s671_s17, %s672_s18  }
  0x58   :  { %s569_s26 = scalar_lea.hbm %s876_s4, 16 }
  0x59   :  { %p570_p12 = scmp.ne.s32.totalorder %s876_s4, %s569_s26  ;;  %p573_p13 = scmp.lt.u32.totalorder %s569_s26, %s876_s4 }
  0x5b   :  { %p575_p0 = pnand %p573_p13, %p570_p12 }
  0x5d   :  { %578 = shalt.err (!%p575_p0)
}
  0x5e   :  { %s579_s9 = scalar_lea.vmem %s74_s15, 16  ;;  %s583_s5 = scalar_lea.vmem %s74_s15, 32 }
  0x5f   :  { %p580_p1 = scmp.ne.s32.totalorder %s74_s15, %s579_s9  ;;  %p584_p2 = scmp.lt.s32.totalorder %s74_s15, %s74_s15 }
  0x60   :  { %p585_p3 = scmp.lt.s32.totalorder %s583_s5, %s579_s9 }
  0x62   :  { %p586_p4 = por %p585_p3, %p584_p2 }
  0x64   :  { %p587_p5 = pnand %p586_p4, %p580_p1 }
  0x66   :  { %590 = shalt.err (!%p587_p5)
}
  0x67   :  { %76 = dma.hbm_to_vmem [thread:$0]  %s876_s4, 16, %s74_s15, [#allocation9]  }
  0x68   :  { %s677_s11 = smov [#allocation13]   ;;  %s678_s14 = smov [#allocation14]  }
  0x69   :  { %s93_s13 = sshll.u32 %s677_s11, 4  ;;  %s103_s16 = sshll.u32 %s678_s14, 4  ;;  %s94_s13 = int_to_ptr.vmem [resolvable:$true] %s93_s13  ;;  %s104_s16 = int_to_ptr.vmem [resolvable:$true] %s103_s16 }
  0x6a   :  { %s591_s21 = scalar_lea.hbm %s878_s6, 16 }
  0x6b   :  { %p592_p6 = scmp.ne.s32.totalorder %s878_s6, %s591_s21  ;;  %p595_p7 = scmp.lt.u32.totalorder %s591_s21, %s878_s6 }
  0x6d   :  { %p597_p8 = pnand %p595_p7, %p592_p6 }
  0x6f   :  { %600 = shalt.err (!%p597_p8)
}
  0x70   :  { %s601_s4 = scalar_lea.vmem %s94_s13, 16  ;;  %s605_s15 = scalar_lea.vmem %s94_s13, 32 }
  0x71   :  { %p602_p9 = scmp.ne.s32.totalorder %s94_s13, %s601_s4  ;;  %p606_p10 = scmp.lt.s32.totalorder %s94_s13, %s94_s13 }
  0x72   :  { %p607_p11 = scmp.lt.s32.totalorder %s605_s15, %s601_s4 }
  0x74   :  { %p608_p12 = por %p607_p11, %p606_p10 }
  0x76   :  { %p609_p13 = pnand %p608_p12, %p602_p9 }
  0x78   :  { %612 = shalt.err (!%p609_p13)
}
  0x79   :  { %96 = dma.hbm_to_vmem [thread:$0]  %s878_s6, 16, %s94_s13, [#allocation12]  }
  0x7a   :  { %s613_s26 = scalar_lea.hbm %s879_s7, 16 }
  0x7b   :  { %p614_p0 = scmp.ne.s32.totalorder %s879_s7, %s613_s26  ;;  %p617_p1 = scmp.lt.u32.totalorder %s613_s26, %s879_s7 }
  0x7d   :  { %p619_p2 = pnand %p617_p1, %p614_p0 }
  0x7f   :  { %622 = shalt.err (!%p619_p2)
}
  0x80   :  { %s623_s9 = scalar_lea.vmem %s104_s16, 16  ;;  %s627_s5 = scalar_lea.vmem %s104_s16, 32 }
  0x81   :  { %p624_p3 = scmp.ne.s32.totalorder %s104_s16, %s623_s9  ;;  %p628_p4 = scmp.lt.s32.totalorder %s104_s16, %s104_s16 }
  0x82   :  { %p629_p5 = scmp.lt.s32.totalorder %s627_s5, %s623_s9 }
  0x84   :  { %p630_p6 = por %p629_p5, %p628_p4 }
  0x86   :  { %p631_p7 = pnand %p630_p6, %p624_p3 }
  0x88   :  { %634 = shalt.err (!%p631_p7)
}
  0x89   :  { %106 = dma.hbm_to_vmem [thread:$0]  %s879_s7, 16, %s104_s16, [#allocation15]  }
  0x8a   :  { %657 = dma.done.wait [#allocation3], 256  }
  0x8b   :  { %658 = vsyncadd [#allocation3], 4294967040 }
  0x8c   :  { %659 = dma.done.wait [#allocation6], 768  }
  0x8d   :  { %660 = vsyncadd [#allocation6], 4294966528 }
  0x8e   :  { %661 = dma.done.wait [#allocation9], 528  }
  0x8f   :  { %662 = vsyncadd [#allocation9], 4294966768 }
  0x90   :  { %663 = dma.done.wait [#allocation12], 32  }
  0x91   :  { %664 = vsyncadd [#allocation12], 4294967264 }
  0x92   :  { %665 = dma.done.wait [#allocation15], 16  }
  0x93   :  { %666 = vsyncadd [#allocation15], 4294967280  ;;  %vm144_vm0 = vcmask 261120   ;;  %v312_v0 = vld [vmem:[#allocation2] sm:$0xff]  ;;  %v313_v1 = vld [vmem:[#allocation2 + $0x8] sm:$0xff]  ;;  %s679_s7 = smov [#allocation16]  }
  0x94   :  { %v133_v2 = vld [vmem:[#allocation7] sm:$0xff]  ;;  %v314_v3 = vsel %vm144_vm0, %v312_v0, 0.0  ;;  %v134_v4 = vld [vmem:[#allocation7 + $0x8] sm:$0xff]  ;;  %v135_v9 = vld [vmem:[#allocation7 + $0x10] sm:$0xff]  ;;  %v317_v12 = vsel %vm144_vm0, %v313_v1, 0.0  ;;  %s370_s10 = sshll.u32 %s679_s7, 4  ;;  %s371_s10 = int_to_ptr.vmem [resolvable:$true] %s370_s10 }
  0x95   :  { %v226_v5 = vld [vmem:[#allocation8] sm:$0xff]  ;;  %v227_v6 = vld [vmem:[#allocation8 + $0x8] sm:$0xff]  ;;  %315 = vadd.xlane.f32.xlu0 %v314_v3  ;;  %v428_v7 = vpack.c.bf16 %v134_v4, %v133_v2  ;;  %v136_v10 = vld [vmem:[#allocation7 + $0x18] sm:$0xff]  ;;  %s635_s11 = scalar_lea.vmem %s371_s10, 256  ;;  %p640_p9 = scmp.lt.s32.totalorder %s371_s10, %s371_s10 }
  0x96   :  { %v436_v8 = vpack.c.bf16 %v227_v6, %v226_v5  ;;  %v228_v11 = vld [vmem:[#allocation8 + $0x10] sm:$0xff]  ;;  %v432_v13 = vpack.c.bf16 %v136_v10, %v135_v9  ;;  %v229_v14 = vld [vmem:[#allocation8 + $0x18] sm:$0xff]  ;;  %v386_v39 = vld [vmem:[#allocation10] ss:$0 sm:$0xff]  ;;  %p636_p8 = scmp.ne.s32.totalorder %s371_s10, %s635_s11  ;;  %p641_p10 = scmp.lt.s32.totalorder %s635_s11, %s635_s11 }
  0x97   :  { %429 = vmatprep.subr.bf16.mxu0 %v428_v7  ;;  %v440_v15 = vpack.c.bf16 %v229_v14, %v228_v11  ;;  %v131_v16 = vld [vmem:[#allocation5] sm:$0xff]  ;;  %v132_v17 = vld [vmem:[#allocation5 + $0x8] sm:$0xff]  ;;  %v392_v40 = vld [vmem:[#allocation13] ss:$0 sm:$0xff] }
  0x98   :  { %437 = vmatprep.subr.bf16.mxu1 %v436_v8  ;;  %431 = vmatpush3.bf16.msra.mxu0 %v428_v7  ;;  %v393_v42 = vld [vmem:[#allocation14] ss:$0 sm:$0xff]  ;;  %v389_v43 = vld [vmem:[#allocation11] ss:$0 sm:$0xff]  ;;  %p642_p11 = por %p641_p10, %p640_p9 }
  0x99   :  { %439 = vmatpush3.bf16.msra.mxu1 %v436_v8  ;;  %318 = vadd.xlane.f32.xlu0 %v317_v12 }
  0x9a   :  { %433 = vmatprep.subr.bf16.mxu0 %v432_v13  ;;  %441 = vmatprep.subr.bf16.mxu1 %v440_v15  ;;  %p643_p12 = pnand %p642_p11, %p636_p8 }
  0x9b   :  { %414 = vmatprep.mubr.msk.f32.mxu0 %vm144_vm0, %v131_v16  ;;  %425 = vmatprep.mubr.msk.f32.mxu1 %vm144_vm0, %v131_v16 }
  0x9c   :  { %435 = vmatpush3.bf16.msra.mxu0 %v432_v13 }
  0x9d   :  { %443 = vmatpush3.bf16.msra.mxu1 %v440_v15 }
  0x9f   :  { %415 = vmatmul.mubr.msk.f32.vlgmr.msra.gmra.mrb[0].mxu0 %vm144_vm0, %v132_v17 }
  0xa0   :  { %426 = vmatmul.mubr.msk.f32.vlgmr.msra.gmra.mrb[0].mxu1 %vm144_vm0, %v132_v17 }
 0x122   :  { %v316_v18 = vpop.xlane.xlu0 %315 }
 0x123   :  { %v321_v19 = vmul.f32 0.03125, %v316_v18 }
 0x125   :  { %v323_v20 = vsub.f32 %v312_v0, %v321_v19 }
 0x126   :  { %v319_v21 = vpop.xlane.xlu0 %318 }
 0x127   :  { %v322_v22 = vmul.f32 0.03125, %v319_v21  ;;  %v325_v23 = vmul.f32 %v323_v20, %v323_v20 }
 0x129   :  { %v324_v24 = vsub.f32 %v313_v1, %v322_v22  ;;  %v327_v25 = vsel %vm144_vm0, %v325_v23, 0.0 }
 0x12a   :  { %328 = vadd.xlane.f32.xlu1 %v327_v25 }
 0x12b   :  { %v326_v26 = vmul.f32 %v324_v24, %v324_v24 }
 0x12d   :  { %v330_v27 = vsel %vm144_vm0, %v326_v26, 0.0 }
 0x12e   :  { %331 = vadd.xlane.f32.xlu1 %v330_v27 }
 0x172   :  { %v416_v28 = vpop.f32.mrb[0].mxu0 }
 0x173   :  { %v427_v29 = vpop.f32.mrb[0].mxu1  ;;  %v217_v30 = vpop.f32.mrb[1].mxu0  ;;  %v223_v50 = vadd.f32 %v416_v28, %v386_v39 }
 0x174   :  { %v303_v31 = vpop.f32.mrb[1].mxu1  ;;  %v218_v44 = vadd.f32 %v386_v39, %v217_v30  ;;  %v309_v54 = vadd.f32 %v427_v29, %v389_v43 }
 0x175   :  { %v304_v49 = vadd.f32 %v389_v43, %v303_v31 }
 0x1b7   :  { %v329_v32 = vpop.xlane.xlu1 %328 }
 0x1b8   :  { %v333_v33 = vmul.f32 0.03125, %v329_v32 }
 0x1ba   :  { %v335_v34 = vadd.f32 1e-05, %v333_v33 }
 0x1bb   :  { %v332_v35 = vpop.xlane.xlu1 %331 }
 0x1bc   :  { %455 = vrsqrt.f32 %v335_v34  ;;  %v334_v36 = vmul.f32 0.03125, %v332_v35 }
 0x1be   :  { %v336_v37 = vadd.f32 1e-05, %v334_v36 }
 0x1c0   :  { %457 = vrsqrt.f32 %v336_v37 }
 0x1c6   :  { %v456_v38 = vpop.eup %455 }
 0x1c7   :  { %v339_v41 = vmul.f32 %v456_v38, %v323_v20 }
 0x1c9   :  { %v348_v45 = vmul.f32 %v392_v40, %v339_v41 }
 0x1ca   :  { %v458_v46 = vpop.eup %457 }
 0x1cb   :  { %v340_v47 = vmul.f32 %v458_v46, %v324_v24  ;;  %v357_v48 = vadd.f32 %v393_v42, %v348_v45 }
 0x1cd   :  { %v349_v51 = vmul.f32 %v392_v40, %v340_v47  ;;  %v359_v52 = vmul.f32 %v357_v48, %v218_v44 }
 0x1cf   :  { %v358_v53 = vadd.f32 %v393_v42, %v349_v51  ;;  %v361_v55 = vadd.f32 %v359_v52, %v304_v49 }
 0x1d1   :  { %v360_v56 = vmul.f32 %v358_v53, %v223_v50  ;;  %363 = vst.msk [vmem:[#allocation16] sm:$0xff] %vm144_vm0, %v361_v55 }
 0x1d3   :  { %v362_v57 = vadd.f32 %v360_v56, %v309_v54 }
 0x1d5   :  { %364 = vst.msk [vmem:[#allocation16 + $0x8] sm:$0xff] %vm144_vm0, %v362_v57 }
 0x1d6   :  { %646 = shalt.err (!%p643_p12)
}
 0x1d7   :  { %s647_s16 = scalar_lea.hbm %s880_s8, 256 }
 0x1d8   :  { %p648_p13 = scmp.ne.s32.totalorder %s880_s8, %s647_s16  ;;  %p651_p0 = scmp.lt.u32.totalorder %s647_s16, %s880_s8 }
 0x1da   :  { %p653_p1 = pnand %p651_p0, %p648_p13 }
 0x1dc   :  { %656 = shalt.err (!%p653_p1)
}
 0x1dd   :  { %376 = dma.vmem_to_hbm [thread:$0]  %s371_s10, 256, %s880_s8, [#allocation4], %s671_s17, %s671_s17, %s672_s18  }
 0x1de   :  { %667 = dma.done.wait [#allocation4], 256  }
 0x1df   :  { %668 = vsyncadd [#allocation4], 4294967040 }
 0x1e0   :  { %380 = vsyncpa [#allocation3], 1 }
 0x1e1   :  { %381 = vsyncpa [#allocation6], 1 }
 0x1e2   :  { %382 = vsyncpa [#allocation9], 1 }
 0x1e3   :  { %383 = vsyncpa [#allocation12], 1 }
 0x1e4   :  { %384 = vsyncpa [#allocation15], 1 }
 0x1e5   :  { %385 = vsyncpa [#allocation4], 1 }

</bundles_post_ra>
